<compile_context>
chip_gen: v7x
topology: tpu7x:2x2x1
jax: 0.10.0
libtpu: 0.0.40
codegen_flags: <defaults>
</compile_context>

<pallas_src>
import functools

import jax
import jax.numpy as jnp
from jax.experimental import pallas as pl
from jax.experimental.pallas import tpu as pltpu

_SUBLANE = 8  # sublane count of a vreg (second-to-last dim, f32)


def _round_up(x: int, m: int) -> int:
    return (x + m - 1) // m * m


def _linear_kernel(x_ref, w_ref, o_ref, *, compute_dtype):
    # (tm, ds) @ (ds, da) -> (tm, da); accumulate in f32 on the MXU.
    x = x_ref[...]
    w = w_ref[...]
    if compute_dtype is not None:
        x = x.astype(compute_dtype)
        w = w.astype(compute_dtype)
    o_ref[...] = jnp.dot(
        x, w, preferred_element_type=jnp.float32
    ).astype(o_ref.dtype)


@functools.partial(jax.jit, static_argnames=("compute_dtype", "block_m"))
def linear_forward(
    state: jax.Array,
    weight_t: jax.Array,
    *,
    compute_dtype=None,
    block_m: int = 2048,
) -> jax.Array:
    """state: (B, ds), weight_t: (ds, da)  ->  (B, da) in state.dtype.

    compute_dtype: None (default) uses the input dtype on the MXU (f32 path,
      matches torch.nn.Linear f32 semantics).  Pass jnp.bfloat16 to opt into
      bf16 MXU compute with f32 accumulation (cast happens inside the kernel).
    block_m: max batch tile size (rounded to a multiple of 8).
    """
    B, ds = state.shape
    ds_w, da = weight_t.shape
    assert ds == ds_w, (ds, ds_w)

    # Batch tile: multiple of 8 sublanes, capped by block_m, and capped so the
    # grid has length >= 2 whenever there is enough work (v7x has 2 TCs and
    # the batch axis is marked "parallel").
    block_m = _round_up(max(block_m, _SUBLANE), _SUBLANE)
    tm = min(block_m, _round_up(B, _SUBLANE))
    if B > _SUBLANE:
        tm = min(tm, max(_round_up(pl.cdiv(B, 2), _SUBLANE), _SUBLANE))

    grid = (pl.cdiv(B, tm),)  # partial last block is masked by Pallas

    # Honest cost estimate: one read of x, one read of w, one write of y.
    flops = 2 * B * ds * da
    bytes_accessed = (
        B * ds * state.dtype.itemsize
        + ds * da * weight_t.dtype.itemsize
        + B * da * state.dtype.itemsize
    )

    kernel = functools.partial(_linear_kernel, compute_dtype=compute_dtype)

    out = pl.pallas_call(
        kernel,
        out_shape=jax.ShapeDtypeStruct((B, da), state.dtype),
        grid=grid,
        in_specs=[
            # Batch-tiled activations, fed straight from HBM (no pre-pass).
            pl.BlockSpec((tm, ds), lambda i: (i, 0)),
            # Weight: constant block index -> DMAed once, stays VMEM-resident.
            pl.BlockSpec((ds, da), lambda i: (0, 0)),
        ],
        out_specs=pl.BlockSpec((tm, da), lambda i: (i, 0)),
        compiler_params=pltpu.CompilerParams(
            dimension_semantics=("parallel",),  # batch axis shards across TCs
        ),
        cost_estimate=pl.CostEstimate(
            flops=flops, transcendentals=0, bytes_accessed=bytes_accessed
        ),
    )(state, weight_t)

    return out


if __name__ == "__main__":
    # Small shapes consistent with the module: batch=8, ds=32, da=16.
    B, ds, da = 8, 32, 16

    key = jax.random.PRNGKey(0)
    k_w, k_x, k_big, k_odd = jax.random.split(key, 4)

    # torch.nn.init.normal_(weight, mean=0.0, std=0.001); torch weight is
    # (da, ds) — we store its transpose (ds, da).
    w_torch_layout = 0.001 * jax.random.normal(k_w, (da, ds), dtype=jnp.float32)
    w_t = w_torch_layout.T  # (ds, da)

    state = jax.random.normal(k_x, (B, ds), dtype=jnp.float32)
    ref = state @ w_torch_layout.T

    # 1) Default f32 path: matches torch.nn.Linear f32 semantics.
    out = linear_forward(state, w_t)
    jax.block_until_ready(out)
    assert out.shape == (B, da) and out.dtype == state.dtype
    assert jnp.allclose(out, ref, atol=1e-6, rtol=1e-6)

    # 2) Opt-in bf16 MXU compute (in-kernel cast, f32 accumulation).
    out_bf16 = linear_forward(state, w_t, compute_dtype=jnp.bfloat16)
    jax.block_until_ready(out_bf16)
    assert out_bf16.shape == (B, da)
    assert jnp.allclose(out_bf16, ref, atol=5e-4, rtol=5e-2)

    # 3) Larger batch: grid length 2, parallel batch axis (both v7x TCs).
    B_big = 2048
    state_big = jax.random.normal(k_big, (B_big, ds), dtype=jnp.float32)
    ref_big = state_big @ w_torch_layout.T
    out_big = linear_forward(state_big, w_t)
    jax.block_until_ready(out_big)
    assert out_big.shape == (B_big, da)
    assert jnp.allclose(out_big, ref_big, atol=1e-6, rtol=1e-6)

    # 4) Batch not divisible by the tile: exercises the masked partial block.
    B_odd = 1000
    state_odd = jax.random.normal(k_odd, (B_odd, ds), dtype=jnp.float32)
    ref_odd = state_odd @ w_torch_layout.T
    out_odd = linear_forward(state_odd, w_t)
    jax.block_until_ready(out_odd)
    assert out_odd.shape == (B_odd, da)
    assert jnp.allclose(out_odd, ref_odd, atol=1e-6, rtol=1e-6)

    print("KERNEL_OK")
</pallas_src>

<mosaic_0001>
module attributes {stable_mosaic.version = 11 : i64} {
  func.func @_linear_kernel(%arg0: i32, %arg1: memref<8x32xf32, #tpu.memory_space<vmem>>, %arg2: memref<32x16xf32, #tpu.memory_space<vmem>>, %arg3: memref<8x16xf32, #tpu.memory_space<vmem>>) attributes {dimension_semantics = [#tpu.dimension_semantics<parallel>], iteration_bounds = array<i64: 1>, scalar_prefetch = 0 : i64, scratch_operands = 0 : i64, tpu.core_type = #tpu.core_type<tc>, window_params = [{transform_indices = @transform_0, window_bounds = array<i64: 8, 32>}, {pipeline_mode = #tpu.pipeline_mode<synchronous>, transform_indices = @transform_1, window_bounds = array<i64: 32, 16>}, {transform_indices = @transform_2, window_bounds = array<i64: 8, 16>}]} {
    %c0 = arith.constant 0 : index
    %c0_0 = arith.constant 0 : index
    %0 = vector.load %arg1[%c0, %c0_0] : memref<8x32xf32, #tpu.memory_space<vmem>>, vector<8x32xf32>
    %c0_1 = arith.constant 0 : index
    %c0_2 = arith.constant 0 : index
    %1 = vector.load %arg2[%c0_1, %c0_2] : memref<32x16xf32, #tpu.memory_space<vmem>>, vector<32x16xf32>
    %cst = arith.constant dense<0.000000e+00> : vector<8x16xf32>
    %2 = tpu.matmul %0, %1, %cst {dimension_numbers = #tpu.dot_dimension_numbers<[1], [0], [0], [1], [0, 0, 1, 1], [], []>} : vector<8x32xf32>, vector<32x16xf32>, vector<8x16xf32> -> vector<8x16xf32>
    %c0_3 = arith.constant 0 : index
    %c0_4 = arith.constant 0 : index
    %3 = vector.load %arg3[%c0_3, %c0_4] : memref<8x16xf32, #tpu.memory_space<vmem>>, vector<8x16xf32>
    tpu.vector_store %arg3[%c0_3, %c0_4], %2 {strides = array<i32>} : memref<8x16xf32, #tpu.memory_space<vmem>>, vector<8x16xf32>,
    return
  }
  func.func @transform_0(%arg0: i32) -> (i32, i32) {
    %c0_i32 = arith.constant 0 : i32
    %c0_i32_0 = arith.constant 0 : i32
    return %arg0, %c0_i32 : i32, i32
  }
  func.func @transform_1(%arg0: i32) -> (i32, i32) {
    %c0_i32 = arith.constant 0 : i32
    %c0_i32_0 = arith.constant 0 : i32
    %c0_i32_1 = arith.constant 0 : i32
    return %c0_i32, %c0_i32_0 : i32, i32
  }
  func.func @transform_2(%arg0: i32) -> (i32, i32) {
    %c0_i32 = arith.constant 0 : i32
    %c0_i32_0 = arith.constant 0 : i32
    return %arg0, %c0_i32 : i32, i32
  }
}

</mosaic_0001>

<bundles_post_ra>
// kernel: linear_forward.1
= control target key start
LH: loop header
LB: loop body
LE: loop exit
PB: predicated region body
PF: predicated region fallthrough
CT: control target
= control target key end

     0   :  { %v158_v3 = vmov 0.0|0.0   ;;  %vm159_vm0 = vmmov 0   ;;  %v160_v6 = vmov 0.0   ;;  %s204_s0 = inlined_call_operand.vmem [shape: f32[8,32], index: 0, kind: input, shape index: {}]   ;;  %s205_s1 = inlined_call_operand.vmem [shape: f32[32,16], index: 1, kind: input, shape index: {}]   ;;  %s206_s2 = inlined_call_operand.hbm [shape: f32[8,16], index: 2, kind: output, shape index: {}]  }
   0x1   :  { %v13_v0 = vld [vmem:[%s205_s1] sm:$0xff]  ;;  %v14_v1 = vld [vmem:[%s205_s1 + $0x8] sm:$0xff]  ;;  %v15_v2 = vld [vmem:[%s205_s1 + $0x10] sm:$0xff]  ;;  %124 = vmatprep.subr.bf16.mxu0 %v158_v3  ;;  %121 = vmatprep.mubr.msk.f32.mxu0 %vm159_vm0, %v160_v6 }
   0x2   :  { %v125_v4 = vpack.c.bf16 %v14_v1, %v13_v0  ;;  %v16_v5 = vld [vmem:[%s205_s1 + $0x18] sm:$0xff] }
   0x3   :  { %7 = vsyncpa [#allocation3], 0  ;;  %v128_v7 = vpack.c.bf16 %v16_v5, %v15_v2  ;;  %v12_v8 = vld [vmem:[%s204_s0] sm:$0xff]  ;;  %vm17_vm1 = vcmask 261120   ;;  %s161_s19 = smov [#allocation2]   ;;  %vm91_vm2 = vcmask 130048  }
   0x4   :  { %126 = vmatpush3.bf16.msra.mxu0 %v125_v4  ;;  %s99_s20 = sshll.u32 %s161_s19, 4  ;;  %s100_s20 = int_to_ptr.vmem [resolvable:$true] %s99_s20 }
   0x5   :  { %127 = vmatprep.subr.bf16.mxu0 %v158_v3  ;;  %s134_s1 = scalar_lea.vmem %s100_s20, 128  ;;  %p139_p1 = scmp.lt.s32.totalorder %s100_s20, %s100_s20 }
   0x6   :  { %p135_p0 = scmp.ne.s32.totalorder %s100_s20, %s134_s1  ;;  %p140_p2 = scmp.lt.s32.totalorder %s134_s1, %s134_s1 }
   0x8   :  { %129 = vmatpush3.bf16.msra.mxu0 %v128_v7  ;;  %p141_p3 = por %p140_p2, %p139_p1 }
   0xa   :  { %p142_p4 = pnand %p141_p3, %p135_p0 }
   0xb   :  { %122 = vmatmul.mubr.msk.f32.vlgmr.msra.gmra.mrb[0].mxu0 %vm17_vm1, %v12_v8 }
  0xde   :  { %v87_v9 = vpop.f32.mrb[0].mxu0 }
  0xdf   :  { %92 = vst.msk [vmem:[#allocation2] sm:$0xff] %vm91_vm2, %v87_v9  ;;  %v123_v10 = vpop.f32.mrb[1].mxu0 }
  0xe0   :  { %145 = shalt.err (!%p142_p4)
}
  0xe1   :  { %s146_s0 = scalar_lea.hbm %s206_s2, 128 }
  0xe2   :  { %p147_p5 = scmp.ne.s32.totalorder %s206_s2, %s146_s0  ;;  %p150_p6 = scmp.lt.u32.totalorder %s146_s0, %s206_s2 }
  0xe4   :  { %p152_p7 = pnand %p150_p6, %p147_p5 }
  0xe6   :  { %155 = shalt.err (!%p152_p7)
}
  0xe7   :  { %102 = dma.vmem_to_hbm [thread:$0]  %s100_s20, 128, %s206_s2, [#allocation3]  }
  0xe8   :  { %156 = dma.done.wait [#allocation3], 128  }
  0xe9   :  { %157 = vsyncadd [#allocation3], 4294967168 }
  0xea   :  { %106 = vsyncpa [#allocation3], 1 }

</bundles_post_ra>
